<compile_context>
chip_gen: v5e
topology: v5e:2x2
jax: 0.10.0
libtpu: 0.0.40
codegen_flags: <defaults>
</compile_context>

<pallas_src>
import math

import jax
import jax.numpy as jnp
from jax import lax
from jax.experimental import pallas as pl
from jax.experimental.pallas import tpu as pltpu

# Loss hyper-parameters (module defaults).
ALPHA = 2.1
OMEGA = 14.0
EPSILON = 1.0
THETA = 0.5
W = 10.0

# Trace-time constant folding (theta/epsilon is a compile-time constant).
_LOG_RATIO = math.log(THETA / EPSILON)   # log(0.5)
_RATIO_INV = EPSILON / THETA             # 2.0
_INV_EPS = 1.0 / EPSILON                 # 1.0

LANES = 128
SUBLANES = 8
MAX_BLOCK_ROWS = 2048   # 2048x128 f32 block = 1 MiB; <=3 inputs double-buffered ~6 MiB VMEM


def _round_up(x, m):
    return ((x + m - 1) // m) * m


def _sublane_tile(dtype):
    # Native sublane tiling by element width (f32/i32: 8, bf16: 16, int8/bool: 32).
    return {4: 8, 2: 16, 1: 32}.get(jnp.dtype(dtype).itemsize, SUBLANES)


def _awing(p, t):
    """Elementwise AWing loss in f32 (EUP-lean: 2 exp + 1 log + 2 log1p + 1 div)."""
    diff = jnp.abs(t - p)
    expo = ALPHA - t
    # (theta/eps)^(alpha - t) via exp of a folded constant log; ^(alpha-t-1) is a mul.
    pow_e = jnp.exp(expo * _LOG_RATIO)
    pow_em1 = pow_e * _RATIO_INV
    A = (OMEGA * _INV_EPS) * expo * pow_em1 / (1.0 + pow_e)
    C = THETA * A - OMEGA * jnp.log1p(pow_e)
    d = diff if _INV_EPS == 1.0 else diff * _INV_EPS
    # d ** ALPHA lowered explicitly; guard d == 0 so loss1(0) is exactly 0 (no NaN).
    d_pow = jnp.where(diff > 0.0, jnp.exp(ALPHA * jnp.log(d)), 0.0)
    loss1 = OMEGA * jnp.log1p(d_pow)
    loss2 = A * diff - C
    return jnp.where(diff < THETA, loss1, loss2)


def _make_kernel(block_rows, valid_rows, need_mask, has_wm):
    """Builds the reduction kernel for a (rows, 128) slab tiled in row blocks."""
    groups = block_rows // SUBLANES

    def kernel(*refs):
        if has_wm:
            p_ref, t_ref, wm_ref, out_ref = refs
        else:
            p_ref, t_ref, out_ref = refs
        step = pl.program_id(0)

        @pl.when(step == 0)
        def _():
            out_ref[...] = jnp.zeros_like(out_ref)

        p = p_ref[...].astype(jnp.float32)
        t = t_ref[...].astype(jnp.float32)
        loss = _awing(p, t)
        if has_wm:
            wfac = W * wm_ref[...].astype(jnp.float32) + 1.0
        else:
            # default weight_map = (targets > 0)  =>  factor in {1, W+1}
            wfac = jnp.where(t > 0.0, W + 1.0, 1.0)
        vals = loss * wfac

        if need_mask:
            # Last block extends past the slab; zero out-of-range rows (garbage reads).
            row_id = step * block_rows + lax.broadcasted_iota(
                jnp.int32, (block_rows, LANES), 0)
            vals = jnp.where(row_id < valid_rows, vals, 0.0)

        # Per-step reduction to one vreg: (groups, 8, 128) -> (8, 128), pure VPU adds.
        out_ref[...] += jnp.sum(vals.reshape(groups, SUBLANES, LANES), axis=0)

    return kernel


def weighted_awing_loss(preds, targets, weight_map=None, *,
                        max_block_rows=MAX_BLOCK_ROWS):
    """Matches WeightedAWingLoss(w=10, alpha=2.1, omega=14, eps=1, theta=0.5).forward."""
    n = preds.size
    out_dtype = preds.dtype
    has_wm = weight_map is not None

    # Keep the weight_map stream narrow in HBM (never widen in the wrapper).
    if has_wm and weight_map.dtype == jnp.bool_:
        weight_map = weight_map.astype(jnp.int8)

    dtypes = [preds.dtype, targets.dtype] + ([weight_map.dtype] if has_wm else [])
    align = max(SUBLANES, max(_sublane_tile(dt) for dt in dtypes))

    rows = pl.cdiv(n, LANES)
    pad_rows = _round_up(rows, align)
    padded_n = pad_rows * LANES

    # TODO(synk): when n is not a multiple of align*128 this jnp.pad costs one extra
    # HBM pass; avoiding it entirely would need a manual-DMA (pl.ANY) tail path.
    def to_slab(x):
        flat = jnp.ravel(x)
        if padded_n != n:
            flat = jnp.pad(flat, (0, padded_n - n))   # zero pad -> contributes 0
        return flat.reshape(pad_rows, LANES)

    operands = [to_slab(preds), to_slab(targets)]
    if has_wm:
        operands.append(to_slab(weight_map))

    # Steps first, then block size: over-coverage is at most ~one align-tile of rows.
    steps0 = pl.cdiv(pad_rows, max_block_rows)
    block_rows = min(_round_up(pl.cdiv(pad_rows, steps0), align), pad_rows)
    steps = pl.cdiv(pad_rows, block_rows)
    need_mask = steps * block_rows > pad_rows

    kernel = _make_kernel(block_rows, pad_rows, need_mask, has_wm)

    in_spec = pl.BlockSpec((block_rows, LANES), lambda i: (i, 0))
    partial = pl.pallas_call(
        kernel,
        out_shape=jax.ShapeDtypeStruct((SUBLANES, LANES), jnp.float32),
        grid=(steps,),
        in_specs=[in_spec] * len(operands),
        out_specs=pl.BlockSpec((SUBLANES, LANES), lambda i: (0, 0)),
        compiler_params=pltpu.CompilerParams(dimension_semantics=("arbitrary",)),
    )(*operands)

    mean = jnp.sum(partial) / jnp.float32(n)
    return mean.astype(out_dtype)


def _reference(preds, targets, weight_map=None):
    """Pure-JAX reference with the original (un-fused) formulation."""
    p = preds.astype(jnp.float32)
    t = targets.astype(jnp.float32)
    diff = jnp.abs(t - p)
    ratio = THETA / EPSILON
    expo = ALPHA - t
    pow_e = jnp.power(ratio, expo)
    pow_em1 = jnp.power(ratio, expo - 1.0)
    A = OMEGA * (1.0 / (1.0 + pow_e)) * expo * pow_em1 * (1.0 / EPSILON)
    C = THETA * A - OMEGA * jnp.log1p(pow_e)
    loss1 = OMEGA * jnp.log1p(jnp.power(diff / EPSILON, ALPHA))
    loss2 = A * diff - C
    loss = jnp.where(diff < THETA, loss1, loss2)
    if weight_map is None:
        wm = (t > 0.0).astype(jnp.float32)
    else:
        wm = weight_map.astype(jnp.float32)
    return jnp.mean(loss * (W * wm + 1.0)).astype(preds.dtype)


if __name__ == "__main__":
    key = jax.random.PRNGKey(0)
    k1, k2, k3, k4 = jax.random.split(key, 4)

    # Heatmap-regression-like inputs: B=2, C=4, H=W=16 (NCHW).
    preds = jax.random.normal(k1, (2, 4, 16, 16), dtype=jnp.float32)
    targets = jax.nn.relu(jax.random.normal(k2, (2, 4, 16, 16), dtype=jnp.float32))

    out = jax.block_until_ready(weighted_awing_loss(preds, targets))
    ref = _reference(preds, targets)
    assert jnp.allclose(out, ref, rtol=2e-5, atol=2e-5), (out, ref)

    # Explicit weight_map path.
    wm = (targets > 0.2).astype(jnp.float32)
    out2 = jax.block_until_ready(weighted_awing_loss(preds, targets, wm))
    ref2 = _reference(preds, targets, wm)
    assert jnp.allclose(out2, ref2, rtol=2e-5, atol=2e-5), (out2, ref2)

    # Ragged path: row count not divisible by the block -> minimal pad + in-kernel
    # row mask (exercised with a small max_block_rows to keep the shapes small).
    preds3 = jax.random.normal(k3, (2, 5, 16, 16), dtype=jnp.float32)
    targets3 = jax.nn.relu(jax.random.normal(k4, (2, 5, 16, 16), dtype=jnp.float32))
    out3 = jax.block_until_ready(
        weighted_awing_loss(preds3, targets3, max_block_rows=16))
    ref3 = _reference(preds3, targets3)
    assert jnp.allclose(out3, ref3, rtol=2e-5, atol=2e-5), (out3, ref3)

    print("KERNEL_OK")
</pallas_src>

<mosaic_0001>
module attributes {stable_mosaic.version = 11 : i64} {
  func.func @kernel(%arg0: i32, %arg1: memref<16x128xf32, #tpu.memory_space<vmem>>, %arg2: memref<16x128xf32, #tpu.memory_space<vmem>>, %arg3: memref<8x128xf32, #tpu.memory_space<vmem>>) attributes {dimension_semantics = [#tpu.dimension_semantics<arbitrary>], iteration_bounds = array<i64: 1>, scalar_prefetch = 0 : i64, scratch_operands = 0 : i64, tpu.core_type = #tpu.core_type<tc>, window_params = [{transform_indices = @transform_0, window_bounds = array<i64: 16, 128>}, {transform_indices = @transform_1, window_bounds = array<i64: 16, 128>}, {pipeline_mode = #tpu.pipeline_mode<synchronous>, transform_indices = @transform_2, window_bounds = array<i64: 8, 128>}]} {
    %c0_i32 = arith.constant 0 : i32
    %0 = arith.cmpi eq, %arg0, %c0_i32 : i32
    %1 = arith.extui %0 : i1 to i32
    %c0_i32_0 = arith.constant 0 : i32
    %2 = arith.cmpi ne, %1, %c0_i32_0 : i32
    scf.if %2 {
      %cst_23 = arith.constant 0.000000e+00 : f32
      %53 = vector.broadcast %cst_23 : f32 to vector<8x128xf32>
      %c0_24 = arith.constant 0 : index
      %c0_25 = arith.constant 0 : index
      %54 = vector.load %arg3[%c0_24, %c0_25] : memref<8x128xf32, #tpu.memory_space<vmem>>, vector<8x128xf32>
      tpu.vector_store %arg3[%c0_24, %c0_25], %53 {strides = array<i32>} : memref<8x128xf32, #tpu.memory_space<vmem>>, vector<8x128xf32>,
    } else {
    }
    %c0 = arith.constant 0 : index
    %c0_1 = arith.constant 0 : index
    %3 = vector.load %arg1[%c0, %c0_1] : memref<16x128xf32, #tpu.memory_space<vmem>>, vector<16x128xf32>
    %c0_2 = arith.constant 0 : index
    %c0_3 = arith.constant 0 : index
    %4 = vector.load %arg2[%c0_2, %c0_3] : memref<16x128xf32, #tpu.memory_space<vmem>>, vector<16x128xf32>
    %5 = arith.subf %4, %3 : vector<16x128xf32>
    %6 = math.absf %5 : vector<16x128xf32>
    %cst = arith.constant 2.100000e+00 : f32
    %7 = vector.broadcast %cst : f32 to vector<16x128xf32>
    %8 = arith.subf %7, %4 : vector<16x128xf32>
    %cst_4 = arith.constant -0.693147182 : f32
    %9 = vector.broadcast %cst_4 : f32 to vector<16x128xf32>
    %10 = arith.mulf %8, %9 : vector<16x128xf32>
    %11 = math.exp %10 : vector<16x128xf32>
    %cst_5 = arith.constant 2.000000e+00 : f32
    %12 = vector.broadcast %cst_5 : f32 to vector<16x128xf32>
    %13 = arith.mulf %11, %12 : vector<16x128xf32>
    %cst_6 = arith.constant 1.400000e+01 : f32
    %14 = vector.broadcast %cst_6 : f32 to vector<16x128xf32>
    %15 = arith.mulf %14, %8 : vector<16x128xf32>
    %16 = arith.mulf %15, %13 : vector<16x128xf32>
    %cst_7 = arith.constant 1.000000e+00 : f32
    %17 = vector.broadcast %cst_7 : f32 to vector<16x128xf32>
    %18 = arith.addf %17, %11 : vector<16x128xf32>
    %19 = arith.divf %16, %18 : vector<16x128xf32>
    %cst_8 = arith.constant 5.000000e-01 : f32
    %20 = vector.broadcast %cst_8 : f32 to vector<16x128xf32>
    %21 = arith.mulf %20, %19 : vector<16x128xf32>
    %22 = math.log1p %11 : vector<16x128xf32>
    %cst_9 = arith.constant 1.400000e+01 : f32
    %23 = vector.broadcast %cst_9 : f32 to vector<16x128xf32>
    %24 = arith.mulf %23, %22 : vector<16x128xf32>
    %25 = arith.subf %21, %24 : vector<16x128xf32>
    %cst_10 = arith.constant 0.000000e+00 : f32
    %26 = vector.broadcast %cst_10 : f32 to vector<16x128xf32>
    %27 = arith.cmpf ogt, %6, %26 : vector<16x128xf32>
    %28 = math.log %6 : vector<16x128xf32>
    %cst_11 = arith.constant 2.100000e+00 : f32
    %29 = vector.broadcast %cst_11 : f32 to vector<16x128xf32>
    %30 = arith.mulf %29, %28 : vector<16x128xf32>
    %31 = math.exp %30 : vector<16x128xf32>
    %cst_12 = arith.constant 0.000000e+00 : f32
    %32 = vector.broadcast %cst_12 : f32 to vector<16x128xf32>
    %33 = arith.select %27, %31, %32 : vector<16x128xi1>, vector<16x128xf32>
    %34 = math.log1p %33 : vector<16x128xf32>
    %cst_13 = arith.constant 1.400000e+01 : f32
    %35 = vector.broadcast %cst_13 : f32 to vector<16x128xf32>
    %36 = arith.mulf %35, %34 : vector<16x128xf32>
    %37 = arith.mulf %19, %6 : vector<16x128xf32>
    %38 = arith.subf %37, %25 : vector<16x128xf32>
    %cst_14 = arith.constant 5.000000e-01 : f32
    %39 = vector.broadcast %cst_14 : f32 to vector<16x128xf32>
    %40 = arith.cmpf olt, %6, %39 : vector<16x128xf32>
    %41 = arith.select %40, %36, %38 : vector<16x128xi1>, vector<16x128xf32>
    %cst_15 = arith.constant 0.000000e+00 : f32
    %42 = vector.broadcast %cst_15 : f32 to vector<16x128xf32>
    %43 = arith.cmpf ogt, %4, %42 : vector<16x128xf32>
    %cst_16 = arith.constant 1.100000e+01 : f32
    %cst_17 = arith.constant 1.000000e+00 : f32
    %44 = vector.broadcast %cst_16 : f32 to vector<16x128xf32>
    %45 = vector.broadcast %cst_17 : f32 to vector<16x128xf32>
    %46 = arith.select %43, %44, %45 : vector<16x128xi1>, vector<16x128xf32>
    %47 = arith.mulf %41, %46 : vector<16x128xf32>
    %c0_18 = arith.constant 0 : index
    %c0_19 = arith.constant 0 : index
    %48 = vector.load %arg3[%c0_18, %c0_19] : memref<8x128xf32, #tpu.memory_space<vmem>>, vector<8x128xf32>
    %49 = vector.shape_cast %47 : vector<16x128xf32> to vector<2x8x128xf32>
    %cst_20 = arith.constant dense<0.000000e+00> : vector<8x128xf32>
    %50 = vector.multi_reduction <add>, %49, %cst_20 [0] : vector<2x8x128xf32> to vector<8x128xf32>
    %51 = arith.addf %48, %50 : vector<8x128xf32>
    %c0_21 = arith.constant 0 : index
    %c0_22 = arith.constant 0 : index
    %52 = vector.load %arg3[%c0_21, %c0_22] : memref<8x128xf32, #tpu.memory_space<vmem>>, vector<8x128xf32>
    tpu.vector_store %arg3[%c0_21, %c0_22], %51 {strides = array<i32>} : memref<8x128xf32, #tpu.memory_space<vmem>>, vector<8x128xf32>,
    return
  }
  func.func @transform_0(%arg0: i32) -> (i32, i32) {
    %c0_i32 = arith.constant 0 : i32
    %c0_i32_0 = arith.constant 0 : i32
    return %arg0, %c0_i32 : i32, i32
  }
  func.func @transform_1(%arg0: i32) -> (i32, i32) {
    %c0_i32 = arith.constant 0 : i32
    %c0_i32_0 = arith.constant 0 : i32
    return %arg0, %c0_i32 : i32, i32
  }
  func.func @transform_2(%arg0: i32) -> (i32, i32) {
    %c0_i32 = arith.constant 0 : i32
    %c0_i32_0 = arith.constant 0 : i32
    %c0_i32_1 = arith.constant 0 : i32
    return %c0_i32, %c0_i32_0 : i32, i32
  }
}

</mosaic_0001>

<bundles_post_ra>
// kernel: tpu_custom_call.1
= control target key start
LH: loop header
LB: loop body
LE: loop exit
PB: predicated region body
PF: predicated region fallthrough
CT: control target
= control target key end

     0   :  { %7 = vsyncpa [#allocation3], 0  ;;  %s386_s0 = inlined_call_operand.hbm [shape: f32[16,128], index: 0, kind: input, shape index: {}]   ;;  %s387_s1 = inlined_call_operand.hbm [shape: f32[16,128], index: 1, kind: input, shape index: {}]   ;;  %s388_s2 = inlined_call_operand.hbm [shape: f32[8,128], index: 2, kind: output, shape index: {}]  }
   0x1   :  { %8 = vsyncpa [#allocation6], 0 }
   0x2   :  { %9 = vsyncpa [#allocation4], 0  ;;  %s14_s11 = sshll.u32 %s386_s0, 4  ;;  %s306_s12 = smov [#allocation2]   ;;  %s15_s11 = int_to_ptr.hbm [resolvable:$true] %s14_s11 }
   0x3   :  { %s16_s13 = sshll.u32 %s306_s12, 4  ;;  %s27_s16 = sshll.u32 %s387_s1, 4  ;;  %s17_s13 = int_to_ptr.vmem [resolvable:$true] %s16_s13  ;;  %s28_s16 = int_to_ptr.hbm [resolvable:$true] %s27_s16 }
   0x4   :  { %s307_s17 = smov 128   ;;  %s308_s18 = smov 8  }
   0x5   :  { %22 = dma.hbm_to_vmem [thread:$0]  %s15_s11, 256, %s17_s13, [#allocation3], %s307_s17, %s307_s17, %s308_s18  }
   0x6   :  { %s309_s19 = smov [#allocation5]  }
   0x7   :  { %s29_s20 = sshll.u32 %s309_s19, 4  ;;  %s30_s20 = int_to_ptr.vmem [resolvable:$true] %s29_s20 }
   0x8   :  { %35 = dma.hbm_to_vmem [thread:$0]  %s28_s16, 256, %s30_s20, [#allocation6], %s307_s17, %s307_s17, %s308_s18  }
   0x9   :  { %300 = dma.done.wait [#allocation3], 256  }
   0xa   :  { %301 = vsyncadd [#allocation3], 4294967040 }
   0xb   :  { %302 = dma.done.wait [#allocation6], 256  }
   0xc   :  { %303 = vsyncadd [#allocation6], 4294967040  ;;  %v49_v0 = vld [vmem:[#allocation2] sm:$0xff]  ;;  %v50_v1 = vld [vmem:[#allocation2 + $0x8] sm:$0xff]  ;;  %s311_s0 = smov [#allocation7]   ;;  %s186_s23 = sshll.u32 %s388_s2, 4  ;;  %s187_s23 = int_to_ptr.hbm [resolvable:$true] %s186_s23 }
   0xd   :  { %v333_v2 = vld [vmem:[#allocation5] sm:$0xff]  ;;  %v335_v3 = vld [vmem:[#allocation5 + $0x8] sm:$0xff]  ;;  %s184_s1 = sshll.u32 %s311_s0, 4  ;;  %s185_s1 = int_to_ptr.vmem [resolvable:$true] %s184_s1 }
   0xe   :  { %v53_v4 = vsub.f32 %v333_v2, %v49_v0  ;;  %v57_v5 = vsub.f32 2.1, %v333_v2  ;;  %v54_v6 = vsub.f32 %v335_v3, %v50_v1  ;;  %v58_v7 = vsub.f32 2.1, %v335_v3 }
   0xf   :  { %vm169_vm14 = vcmp.gt.f32.partialorder %v333_v2, 0.0  ;;  %vm170_vm15 = vcmp.gt.f32.partialorder %v335_v3, 0.0 }
  0x10   :  { %v341_v8 = vand.u32 2147483647, %v53_v4  ;;  %v59_v9 = vmul.f32 -0.6931472, %v57_v5  ;;  %v343_v10 = vand.u32 2147483647, %v54_v6 }
  0x11   :  { %v60_v11 = vmul.f32 -0.6931472, %v58_v7  ;;  %v67_v23 = vmul.f32 14.0, %v57_v5  ;;  %v68_v25 = vmul.f32 14.0, %v58_v7 }
  0x12   :  { %v61_v12 = vmul.f32 1.442695, %v59_v9  ;;  %204 = vlog2.f32 %v341_v8  ;;  %vm127_vm0 = vcmp.gt.f32.partialorder %v341_v8, 0.0  ;;  %vm128_vm11 = vcmp.gt.f32.partialorder %v343_v10, 0.0 }
  0x13   :  { %v63_v13 = vmul.f32 1.442695, %v60_v11  ;;  %206 = vlog2.f32 %v343_v10 }
  0x14   :  { %208 = vpow2.f32 %v61_v12 }
  0x15   :  { %210 = vpow2.f32 %v63_v13 }
  0x18   :  { %v205_v14 = vpop.eup %204 }
  0x19   :  { %v207_v15 = vpop.eup %206  ;;  %v130_v20 = vmul.f32 0.6931472, %v205_v14 }
  0x1a   :  { %v209_v16 = vpop.eup %208  ;;  %v132_v21 = vmul.f32 0.6931472, %v207_v15 }
  0x1b   :  { %v211_v17 = vpop.eup %210  ;;  %v71_v18 = vadd.f32 1.0, %v209_v16  ;;  %v65_v22 = vmul.f32 2.0, %v209_v16  ;;  %v108_v24 = vmul.f32 -0.5, %v209_v16  ;;  %v111_v26 = vand.u32 2147483647, %v209_v16 }
  0x1c   :  { %v72_v19 = vadd.f32 1.0, %v211_v17  ;;  %v117_v27 = vmul.f32 -0.5, %v211_v17  ;;  %v66_v28 = vmul.f32 2.0, %v211_v17  ;;  %v133_v29 = vmul.f32 2.1, %v130_v20 }
  0x1d   :  { %212 = vrcp.f32 %v71_v18  ;;  %v134_v30 = vmul.f32 2.1, %v132_v21  ;;  %v69_v32 = vmul.f32 %v67_v23, %v65_v22  ;;  %vm78_vm1 = vweird.f32 %v71_v18 }
  0x1e   :  { %214 = vrcp.f32 %v72_v19  ;;  %v84_v33 = vand.u32 2147483648, %v71_v18  ;;  %v120_v34 = vand.u32 2147483647, %v211_v17  ;;  %v109_v37 = vadd.f32 1.0, %v108_v24 }
  0x1f   :  { %216 = vlog2.f32 %v71_v18  ;;  %v135_v38 = vmul.f32 1.442695, %v133_v29  ;;  %v137_v39 = vmul.f32 1.442695, %v134_v30  ;;  %v82_v41 = vand.u32 2147483647, %v71_v18 }
  0x20   :  { %218 = vlog2.f32 %v72_v19  ;;  %vm93_vm2 = vweird.f32 %v72_v19  ;;  %v118_v43 = vadd.f32 1.0, %v117_v27  ;;  %v99_v46 = vand.u32 2147483648, %v72_v19 }
  0x21   :  { %220 = vpow2.f32 %v135_v38  ;;  %v97_v48 = vand.u32 2147483647, %v72_v19  ;;  %v85_v50 = vor.u32 1.1754944e-38, %v84_v33  ;;  %v110_v52 = vmul.f32 %v209_v16, %v109_v37 }
  0x22   :  { %222 = vpow2.f32 %v137_v39  ;;  %vm353_vm6 = vcmp.lt.f32.partialorder %v111_v26, 0.0004427343  ;;  %v119_v57 = vmul.f32 %v211_v17, %v118_v43  ;;  %vm83_vm7 = vcmp.eq.f32.partialorder %v82_v41, 8.507059e+37 }
  0x23   :  { %v213_v31 = vpop.eup %212  ;;  %v100_v60 = vor.u32 1.1754944e-38, %v99_v46  ;;  %vm362_vm9 = vcmp.lt.f32.partialorder %v120_v34, 0.0004427343  ;;  %v70_v62 = vmul.f32 %v68_v25, %v66_v28  ;;  %vm98_vm10 = vcmp.eq.f32.partialorder %v97_v48, 8.507059e+37 }
  0x24   :  { %v215_v35 = vpop.eup %214  ;;  %v74_v36 = vmul.f32 %v213_v31, %v71_v18  ;;  %vm79_vm3 = vweird.f32 %v213_v31  ;;  %v310_v43 = vmov 1.0  }
  0x25   :  { %v217_v40 = vpop.eup %216  ;;  %v89_v42 = vmul.f32 %v215_v35, %v72_v19  ;;  %vm94_vm4 = vweird.f32 %v215_v35  ;;  %vm349_vm5 = vmor %vm78_vm1, %vm79_vm3  ;;  %vm166_vm1 = vcmp.lt.f32.partialorder %v343_v10, 0.5  ;;  %v172_v46 = vsel %vm170_vm15, 11.0, %v310_v43 }
  0x26   :  { %v219_v44 = vpop.eup %218  ;;  %v75_v45 = vsub.f32 1.0, %v74_v36  ;;  %v107_v51 = vmul.f32 0.6931472, %v217_v40  ;;  %vm358_vm8 = vmor %vm93_vm2, %vm94_vm4 }
  0x27   :  { %v90_v47 = vsub.f32 1.0, %v89_v42  ;;  %v116_v56 = vmul.f32 0.6931472, %v219_v44  ;;  %v221_v0 = vpop.eup %220  ;;  %v171_v44 = vsel %vm169_vm14, 11.0, %v310_v43 }
  0x28   :  { %v76_v49 = vmul.f32 %v213_v31, %v75_v45  ;;  %v113_v4 = vsel %vm353_vm6, %v110_v52, %v107_v51  ;;  %v223_v5 = vpop.eup %222  ;;  %v139_v11 = vsel %vm127_vm0, %v221_v0, 0.0  ;;  %vm165_vm0 = vcmp.lt.f32.partialorder %v341_v8, 0.5 }
  0x29   :  { %v91_v54 = vmul.f32 %v215_v35, %v90_v47  ;;  %v122_v9 = vsel %vm362_vm9, %v119_v57, %v116_v56  ;;  %v140_v14 = vsel %vm128_vm11, %v223_v5, 0.0  ;;  %v141_v15 = vadd.f32 1.0, %v139_v11 }
  0x2a   :  { %v77_v58 = vadd.f32 %v213_v31, %v76_v49  ;;  %v144_v17 = vmul.f32 -0.5, %v139_v11  ;;  %v150_v18 = vadd.f32 1.0, %v140_v14  ;;  %v123_v20 = vmul.f32 14.0, %v113_v4 }
  0x2b   :  { %v92_v63 = vadd.f32 %v215_v35, %v91_v54  ;;  %224 = vlog2.f32 %v141_v15  ;;  %v153_v21 = vmul.f32 -0.5, %v140_v14  ;;  %v124_v23 = vmul.f32 14.0, %v122_v9 }
  0x2c   :  { %v81_v1 = vsel %vm349_vm5, %v213_v31, %v77_v58  ;;  %v145_v24 = vadd.f32 1.0, %v144_v17  ;;  %226 = vlog2.f32 %v150_v18  ;;  %v147_v25 = vand.u32 2147483647, %v139_v11 }
  0x2d   :  { %v86_v6 = vsel %vm83_vm7, %v85_v50, %v81_v1  ;;  %v96_v7 = vsel %vm358_vm8, %v215_v35, %v92_v63  ;;  %v154_v26 = vadd.f32 1.0, %v153_v21  ;;  %v156_v27 = vand.u32 2147483647, %v140_v14 }
  0x2e   :  { %v87_v12 = vmul.f32 %v86_v6, %v69_v32  ;;  %v101_v13 = vsel %vm98_vm10, %v100_v60, %v96_v7  ;;  %v146_v31 = vmul.f32 %v145_v24, %v139_v11  ;;  %vm148_vm12 = vcmp.lt.f32.partialorder %v147_v25, 0.0004427343 }
  0x2f   :  { %v102_v16 = vmul.f32 %v101_v13, %v70_v62  ;;  %v155_v34 = vmul.f32 %v154_v26, %v140_v14  ;;  %vm157_vm13 = vcmp.lt.f32.partialorder %v156_v27, 0.0004427343 }
  0x30   :  { %v103_v19 = vmul.f32 0.5, %v87_v12  ;;  %v161_v29 = vmul.f32 %v87_v12, %v341_v8 }
  0x31   :  { %v104_v22 = vmul.f32 0.5, %v102_v16  ;;  %v162_v32 = vmul.f32 %v102_v16, %v343_v10  ;;  %v225_v33 = vpop.eup %224 }
  0x32   :  { %v125_v28 = vsub.f32 %v103_v19, %v123_v20  ;;  %v227_v35 = vpop.eup %226  ;;  %v143_v36 = vmul.f32 0.6931472, %v225_v33 }
  0x33   :  { %v126_v30 = vsub.f32 %v104_v22, %v124_v23  ;;  %v152_v37 = vmul.f32 0.6931472, %v227_v35 }
  0x34   :  { %v163_v38 = vsub.f32 %v161_v29, %v125_v28  ;;  %v149_v39 = vsel %vm148_vm12, %v146_v31, %v143_v36 }
  0x35   :  { %v164_v40 = vsub.f32 %v162_v32, %v126_v30  ;;  %v158_v41 = vsel %vm157_vm13, %v155_v34, %v152_v37  ;;  %v159_v42 = vmul.f32 14.0, %v149_v39 }
  0x36   :  { %v160_v45 = vmul.f32 14.0, %v158_v41 }
  0x37   :  { %v167_v47 = vsel %vm165_vm0, %v159_v42, %v163_v38 }
  0x38   :  { %v168_v48 = vsel %vm166_vm1, %v160_v45, %v164_v40  ;;  %v173_v49 = vmul.f32 %v171_v44, %v167_v47 }
  0x39   :  { %v174_v2 = vmul.f32 %v172_v46, %v168_v48 }
  0x3b   :  { %v176_v3 = vadd.f32 %v174_v2, %v173_v49 }
  0x3d   :  { %178 = vst [vmem:[#allocation7] sm:$0xff] %v176_v3 }
  0x3e   :  { %189 = dma.vmem_to_hbm [thread:$0]  %s185_s1, 128, %s187_s23, [#allocation4]  }
  0x3f   :  { %304 = dma.done.wait [#allocation4], 128  }
  0x40   :  { %305 = vsyncadd [#allocation4], 4294967168 }
  0x41   :  { %194 = vsyncpa [#allocation3], 1 }
  0x42   :  { %195 = vsyncpa [#allocation6], 1 }
  0x43   :  { %196 = vsyncpa [#allocation4], 1 }

</bundles_post_ra>
